<compile_context>
chip_gen: v7x
topology: tpu7x:2x2x1
jax: 0.10.0
libtpu: 0.0.40
codegen_flags: <defaults>
</compile_context>

<pallas_src>
import functools
from typing import NamedTuple

import jax
import jax.numpy as jnp
from jax.experimental import pallas as pl
from jax.experimental.pallas import tpu as pltpu


class PostnetConfig(NamedTuple):
    input_dim: int
    conv_channels: int
    kernel_size: int
    n_layers: int
    dropout: float


def _round_up(x, m):
    return (x + m - 1) // m * m


# ------------------------------------------------------------------ kernel ---

def _postnet_fused_kernel(x_ref, w_ref, b_ref, o_ref, act_ref, *,
                          n_layers, tap_offsets, bc, ttot, lpad, t_len,
                          c_in, c_out, m_step):
    """Fused Postnet stack for one batch chunk: n_layers x (Conv1d -> BN(eval) -> Tanh?).

    x_ref:   (bc, T, Cin)      bf16  raw input chunk (no padding; lanes = Cin).
    w_ref:   (L, K*Cp, Cp)     bf16  im2col conv weights with BN scale folded in
                                     (constant index_map -> resident in VMEM).
    b_ref:   (L, 1, Cp)        f32   folded BN bias (beta - mean*scale).
    o_ref:   (bc, T, Cout)     f32   output chunk (narrow lanes; no padded buffer).
    act_ref: (bc*ttot, Cp)     bf16  VMEM scratch holding the halo'd, lane-padded
                                     activation of the current layer (never leaves VMEM).
    """
    cp = act_ref.shape[-1]
    dt = act_ref.dtype

    # ---- stage: zero halos / time-pad / lane-pad, then drop each sample in place.
    # All rows a layer's taps can read are either real data (overwritten below) or
    # stay zero -> 'same' convolution boundaries are exact, no mask needed anywhere.
    act_ref[...] = jnp.zeros_like(act_ref)
    lane_pad = jnp.zeros((t_len, cp - c_in), dt) if cp > c_in else None  # hoisted
    for bb in range(bc):
        xb = x_ref[bb].astype(dt)                                  # (T, Cin)
        if lane_pad is not None:
            xb = jnp.concatenate([xb, lane_pad], axis=-1)          # (T, Cp) full-lane store
        act_ref[bb * ttot + lpad: bb * ttot + lpad + t_len, :] = xb

    # ---- fused conv/BN/tanh stack; activations stay resident in VMEM ----
    for layer in range(n_layers):
        # im2col: K shifted sublane views concatenated along lanes -> one MXU
        # matmul with contraction K*Cp instead of K tiny per-tap matmuls.
        cols = [act_ref[off:off + m_step, :] for off in tap_offsets]
        xim = jnp.concatenate(cols, axis=-1)                       # (m_step, K*Cp) bf16
        acc = jnp.dot(xim, w_ref[layer],
                      preferred_element_type=jnp.float32)          # (m_step, Cp) f32
        y = acc + b_ref[layer]                                     # folded BN bias
        if layer != n_layers - 1:
            y = jnp.tanh(y).astype(dt)                             # f32 tanh, bf16 store
            # Write back ONLY the valid T rows of each sample; halo / time-pad /
            # inter-sample rows keep their staged zeros (replaces the old mask).
            for bb in range(bc):
                act_ref[bb * ttot + lpad: bb * ttot + lpad + t_len, :] = (
                    y[bb * ttot: bb * ttot + t_len, :])
        else:
            # Final layer: scatter straight into the narrow output tile.
            for bb in range(bc):
                o_ref[bb, :, :] = (
                    y[bb * ttot: bb * ttot + t_len, :c_out].astype(o_ref.dtype))


# ---------------------------------------------------------------- wrapper ----

def postnet_forward(params, x_btc, *, eps=1e-5, matmul_dtype=jnp.bfloat16,
                    rows_per_step=1024):
    """x_btc: (B, T, input_dim) -> (B, T, input_dim).

    Matches Postnet.forward in eval mode:
        transpose -> [Conv1d -> BatchNorm1d -> (Tanh) -> Dropout]* -> transpose
    (the transposes cancel in this layout; Dropout is inference identity).
    """
    B, T, c_in = x_btc.shape
    n_layers = len(params)
    K = params[0]["w"].shape[0]
    assert K % 2 == 1, "padding=(K-1)//2 is only 'same' for odd kernel_size"
    pad = (K - 1) // 2
    c_out = params[-1]["w"].shape[2]

    max_ch = max(max(p["w"].shape[1], p["w"].shape[2]) for p in params)
    Cp = _round_up(max_ch, 128)            # lane-dense channels for the MXU
    T8 = _round_up(T, 8)                   # sublane-aligned time
    lpad = _round_up(max(pad, 1), 8)       # per-sample halo, sublane-aligned
    ttot = lpad + T8 + lpad                # rows per sample in the VMEM scratch
    tap_offsets = tuple(lpad - pad + k for k in range(K))

    # ---- batch-chunk grid: ~rows_per_step matmul rows per step, but keep >= 2
    # grid steps when B > 1 so v7x megacore and the DMA pipeline always get work.
    bc = max(1, min(B, rows_per_step // ttot))
    if B > 1:
        bc = max(1, min(bc, (B + 1) // 2))
    n_steps = -(-B // bc)
    Bp = n_steps * bc
    m_step = (bc - 1) * ttot + T8          # matmul M rows per grid step

    # ---- fold BN (eval) into conv weights / bias; pad to Cp and stack layers ----
    w_list, b_list = [], []
    for p in params:
        _, cin_l, cout_l = p["w"].shape
        scale = p["gamma"] / jnp.sqrt(p["running_var"] + eps)            # (cout,)
        bias = p["beta"] - p["running_mean"] * scale                     # (cout,)
        w_fold = p["w"] * scale[None, None, :]                           # (K,cin,cout)
        w_pad = jnp.zeros((K, Cp, Cp), jnp.float32).at[:, :cin_l, :cout_l].set(w_fold)
        w_list.append(w_pad.reshape(K * Cp, Cp))                         # im2col layout
        b_list.append(jnp.zeros((Cp,), jnp.float32).at[:cout_l].set(bias).reshape(1, Cp))
    w_all = jnp.stack(w_list).astype(matmul_dtype)                       # (L, K*Cp, Cp)
    b_all = jnp.stack(b_list)                                            # (L, 1, Cp) f32

    # ---- input: just cast to bf16 (halves input DMA); pad batch to bc multiple ----
    x_in = x_btc.astype(matmul_dtype)
    if Bp > B:
        x_in = jnp.pad(x_in, ((0, Bp - B), (0, 0), (0, 0)))

    # ---- explicit VMEM budget (valid on v7x's 64 MiB as well) ----
    bpe = jnp.dtype(matmul_dtype).itemsize
    est = (2 * bc * T * c_in * bpe            # x tile, double-buffered
           + 2 * bc * T * c_out * 4           # out tile, double-buffered
           + 2 * n_layers * K * Cp * Cp * bpe  # resident weights (2 bufs)
           + 2 * n_layers * Cp * 4            # resident bias
           + bc * ttot * Cp * bpe             # activation scratch
           + m_step * K * Cp * bpe            # im2col temp
           + 2 * m_step * Cp * 4)             # f32 acc / tanh temps
    vmem_limit = int(min(max(2 * est, 16 * 2 ** 20), 64 * 2 ** 20))

    kernel = functools.partial(
        _postnet_fused_kernel, n_layers=n_layers, tap_offsets=tap_offsets,
        bc=bc, ttot=ttot, lpad=lpad, t_len=T, c_in=c_in, c_out=c_out,
        m_step=m_step)

    out = pl.pallas_call(
        kernel,
        out_shape=jax.ShapeDtypeStruct((Bp, T, c_out), jnp.float32),
        grid_spec=pltpu.PrefetchScalarGridSpec(
            num_scalar_prefetch=0,
            grid=(n_steps,),
            in_specs=[
                pl.BlockSpec((bc, T, c_in), lambda i: (i, 0, 0)),
                pl.BlockSpec((n_layers, K * Cp, Cp), lambda i: (0, 0, 0)),
                pl.BlockSpec((n_layers, 1, Cp), lambda i: (0, 0, 0)),
            ],
            out_specs=pl.BlockSpec((bc, T, c_out), lambda i: (i, 0, 0)),
            scratch_shapes=[pltpu.VMEM((bc * ttot, Cp), matmul_dtype)],
        ),
        compiler_params=pltpu.CompilerParams(
            dimension_semantics=("parallel",),
            vmem_limit_bytes=vmem_limit,
        ),
    )(x_in, w_all, b_all)

    return out[:B] if Bp > B else out


# ----------------------------------------------------------------- params ----

def init_postnet_params(key, config: PostnetConfig):
    """Deterministic synthetic parameters matching Postnet.__init__ shapes."""
    params = []
    for layer in range(config.n_layers):
        in_ch = config.input_dim if layer == 0 else config.conv_channels
        out_ch = config.input_dim if layer == config.n_layers - 1 else config.conv_channels
        key, kw, kg, kb, km, kv = jax.random.split(key, 6)
        # Conv1d weight in PyTorch is (out_ch, in_ch, K); stored here as (K, in_ch, out_ch).
        w = 0.1 * jax.random.normal(kw, (config.kernel_size, in_ch, out_ch), jnp.float32)
        gamma = 1.0 + 0.1 * jax.random.normal(kg, (out_ch,), jnp.float32)
        beta = 0.1 * jax.random.normal(kb, (out_ch,), jnp.float32)
        run_mean = 0.1 * jax.random.normal(km, (out_ch,), jnp.float32)
        run_var = jnp.abs(1.0 + 0.1 * jax.random.normal(kv, (out_ch,), jnp.float32))
        params.append(dict(w=w, gamma=gamma, beta=beta,
                           running_mean=run_mean, running_var=run_var))
    return params


# -------------------------------------------------------------- reference ----

def postnet_reference(params, x_btc, *, eps=1e-5, matmul_dtype=None):
    """Pure-JAX reference.  If matmul_dtype is set, the conv matmul inputs are
    cast to that dtype (mirroring the kernel's MXU dtype) with f32 accumulation;
    with matmul_dtype=None this is the exact f32 module semantics."""
    n_layers = len(params)
    y = x_btc
    for layer, p in enumerate(params):
        K = p["w"].shape[0]
        pad = (K - 1) // 2
        scale = p["gamma"] / jnp.sqrt(p["running_var"] + eps)
        bias = p["beta"] - p["running_mean"] * scale
        w_fold = p["w"] * scale[None, None, :]
        a = y
        if matmul_dtype is not None:
            a = a.astype(matmul_dtype)
            w_fold = w_fold.astype(matmul_dtype)
        xp = jnp.pad(a, ((0, 0), (pad, K - 1 - pad), (0, 0)))
        T = y.shape[1]
        shifted = jnp.stack([xp[:, k:k + T, :] for k in range(K)], axis=0)
        conv = jnp.einsum("kbti,kio->bto", shifted, w_fold,
                          preferred_element_type=jnp.float32)
        y = conv + bias
        if layer != n_layers - 1:
            y = jnp.tanh(y)
    return y


# ------------------------------------------------------------------- main ----

if __name__ == "__main__":
    config = PostnetConfig(input_dim=16, conv_channels=32, kernel_size=5,
                           n_layers=3, dropout=0.5)

    key = jax.random.PRNGKey(0)
    key_x, key_p = jax.random.split(key)

    B, T = 2, 24
    x = jax.random.normal(key_x, (B, T, config.input_dim), jnp.float32)
    params = init_postnet_params(key_p, config)

    out = postnet_forward(params, x)
    out = jax.block_until_ready(out)
    assert out.shape == (B, T, config.input_dim)

    # Tight check vs. a reference that mirrors the kernel's bf16 MXU inputs.
    ref_bf16 = postnet_reference(params, x, matmul_dtype=jnp.bfloat16)
    assert jnp.allclose(out, ref_bf16, atol=5e-3, rtol=5e-3), "mismatch vs bf16 reference"

    # Looser sanity check vs. the pure-f32 module semantics (bf16 MXU rounding).
    ref_f32 = postnet_reference(params, x)
    assert jnp.allclose(out, ref_f32, atol=5e-2, rtol=5e-2), "mismatch vs f32 reference"

    print("KERNEL_OK")
</pallas_src>

<mosaic_0001>
module attributes {stable_mosaic.version = 11 : i64} {
  func.func @_postnet_fused_kernel(%arg0: i32, %arg1: memref<1x24x16xbf16, #tpu.memory_space<vmem>>, %arg2: memref<3x640x128xbf16, #tpu.memory_space<vmem>>, %arg3: memref<3x1x128xf32, #tpu.memory_space<vmem>>, %arg4: memref<1x24x16xf32, #tpu.memory_space<vmem>>, %arg5: memref<40x128xbf16, #tpu.memory_space<vmem>>) attributes {dimension_semantics = [#tpu.dimension_semantics<parallel>], iteration_bounds = array<i64: 2>, scalar_prefetch = 0 : i64, scratch_operands = 1 : i64, tpu.core_type = #tpu.core_type<tc>, window_params = [{transform_indices = @transform_0, window_bounds = array<i64: 1, 24, 16>}, {pipeline_mode = #tpu.pipeline_mode<synchronous>, transform_indices = @transform_1, window_bounds = array<i64: 3, 640, 128>}, {pipeline_mode = #tpu.pipeline_mode<synchronous>, transform_indices = @transform_2, window_bounds = array<i64: 3, 1, 128>}, {transform_indices = @transform_3, window_bounds = array<i64: 1, 24, 16>}]} {
    %cst = arith.constant 0.000000e+00 : bf16
    %0 = vector.broadcast %cst : bf16 to vector<40x128xbf16>
    %c0 = arith.constant 0 : index
    %c0_0 = arith.constant 0 : index
    %1 = vector.load %arg5[%c0, %c0_0] : memref<40x128xbf16, #tpu.memory_space<vmem>>, vector<40x128xbf16>
    tpu.vector_store %arg5[%c0, %c0_0], %0 {strides = array<i32>} : memref<40x128xbf16, #tpu.memory_space<vmem>>, vector<40x128xbf16>,
    %cst_1 = arith.constant 0.000000e+00 : bf16
    %2 = vector.broadcast %cst_1 : bf16 to vector<24x112xbf16>
    %c0_2 = arith.constant 0 : index
    %c0_3 = arith.constant 0 : index
    %c0_4 = arith.constant 0 : index
    %3 = vector.load %arg1[%c0_2, %c0_3, %c0_4] : memref<1x24x16xbf16, #tpu.memory_space<vmem>>, vector<1x24x16xbf16>
    %4 = vector.shape_cast %3 : vector<1x24x16xbf16> to vector<24x16xbf16>
    %5 = tpu.concatenate %4, %2 in 1 : vector<24x16xbf16>, vector<24x112xbf16> -> vector<24x128xbf16>
    %c8 = arith.constant 8 : index
    %c0_5 = arith.constant 0 : index
    %6 = vector.load %arg5[%c8, %c0_5] : memref<40x128xbf16, #tpu.memory_space<vmem>>, vector<24x128xbf16>
    tpu.vector_store %arg5[%c8, %c0_5], %5 {strides = array<i32>} : memref<40x128xbf16, #tpu.memory_space<vmem>>, vector<24x128xbf16>,
    %c6 = arith.constant 6 : index
    %c0_6 = arith.constant 0 : index
    %7 = vector.load %arg5[%c6, %c0_6] : memref<40x128xbf16, #tpu.memory_space<vmem>>, vector<24x128xbf16>
    %c7 = arith.constant 7 : index
    %c0_7 = arith.constant 0 : index
    %8 = vector.load %arg5[%c7, %c0_7] : memref<40x128xbf16, #tpu.memory_space<vmem>>, vector<24x128xbf16>
    %c8_8 = arith.constant 8 : index
    %c0_9 = arith.constant 0 : index
    %9 = vector.load %arg5[%c8_8, %c0_9] : memref<40x128xbf16, #tpu.memory_space<vmem>>, vector<24x128xbf16>
    %c9 = arith.constant 9 : index
    %c0_10 = arith.constant 0 : index
    %10 = vector.load %arg5[%c9, %c0_10] : memref<40x128xbf16, #tpu.memory_space<vmem>>, vector<24x128xbf16>
    %c10 = arith.constant 10 : index
    %c0_11 = arith.constant 0 : index
    %11 = vector.load %arg5[%c10, %c0_11] : memref<40x128xbf16, #tpu.memory_space<vmem>>, vector<24x128xbf16>
    %12 = tpu.concatenate %7, %8, %9, %10, %11 in 1 : vector<24x128xbf16>, vector<24x128xbf16>, vector<24x128xbf16>, vector<24x128xbf16>, vector<24x128xbf16> -> vector<24x640xbf16>
    %c0_12 = arith.constant 0 : index
    %c0_13 = arith.constant 0 : index
    %c0_14 = arith.constant 0 : index
    %13 = vector.load %arg2[%c0_12, %c0_13, %c0_14] : memref<3x640x128xbf16, #tpu.memory_space<vmem>>, vector<1x640x128xbf16>
    %14 = vector.shape_cast %13 : vector<1x640x128xbf16> to vector<640x128xbf16>
    %cst_15 = arith.constant dense<0.000000e+00> : vector<24x128xf32>
    %15 = tpu.matmul %12, %14, %cst_15 {dimension_numbers = #tpu.dot_dimension_numbers<[1], [0], [0], [1], [0, 0, 1, 1], [], []>} : vector<24x640xbf16>, vector<640x128xbf16>, vector<24x128xf32> -> vector<24x128xf32>
    %c0_16 = arith.constant 0 : index
    %c0_17 = arith.constant 0 : index
    %c0_18 = arith.constant 0 : index
    %16 = vector.load %arg3[%c0_16, %c0_17, %c0_18] : memref<3x1x128xf32, #tpu.memory_space<vmem>>, vector<1x1x128xf32>
    %17 = vector.shape_cast %16 : vector<1x1x128xf32> to vector<1x128xf32>
    %18 = vector.broadcast %17 : vector<1x128xf32> to vector<24x128xf32>
    %19 = arith.addf %15, %18 : vector<24x128xf32>
    %20 = math.tanh %19 : vector<24x128xf32>
    %21 = arith.truncf %20 : vector<24x128xf32> to vector<24x128xbf16>
    %c8_19 = arith.constant 8 : index
    %c0_20 = arith.constant 0 : index
    %22 = vector.load %arg5[%c8_19, %c0_20] : memref<40x128xbf16, #tpu.memory_space<vmem>>, vector<24x128xbf16>
    tpu.vector_store %arg5[%c8_19, %c0_20], %21 {strides = array<i32>} : memref<40x128xbf16, #tpu.memory_space<vmem>>, vector<24x128xbf16>,
    %c6_21 = arith.constant 6 : index
    %c0_22 = arith.constant 0 : index
    %23 = vector.load %arg5[%c6_21, %c0_22] : memref<40x128xbf16, #tpu.memory_space<vmem>>, vector<24x128xbf16>
    %c7_23 = arith.constant 7 : index
    %c0_24 = arith.constant 0 : index
    %24 = vector.load %arg5[%c7_23, %c0_24] : memref<40x128xbf16, #tpu.memory_space<vmem>>, vector<24x128xbf16>
    %c8_25 = arith.constant 8 : index
    %c0_26 = arith.constant 0 : index
    %25 = vector.load %arg5[%c8_25, %c0_26] : memref<40x128xbf16, #tpu.memory_space<vmem>>, vector<24x128xbf16>
    %c9_27 = arith.constant 9 : index
    %c0_28 = arith.constant 0 : index
    %26 = vector.load %arg5[%c9_27, %c0_28] : memref<40x128xbf16, #tpu.memory_space<vmem>>, vector<24x128xbf16>
    %c10_29 = arith.constant 10 : index
    %c0_30 = arith.constant 0 : index
    %27 = vector.load %arg5[%c10_29, %c0_30] : memref<40x128xbf16, #tpu.memory_space<vmem>>, vector<24x128xbf16>
    %28 = tpu.concatenate %23, %24, %25, %26, %27 in 1 : vector<24x128xbf16>, vector<24x128xbf16>, vector<24x128xbf16>, vector<24x128xbf16>, vector<24x128xbf16> -> vector<24x640xbf16>
    %c1 = arith.constant 1 : index
    %c0_31 = arith.constant 0 : index
    %c0_32 = arith.constant 0 : index
    %29 = vector.load %arg2[%c1, %c0_31, %c0_32] : memref<3x640x128xbf16, #tpu.memory_space<vmem>>, vector<1x640x128xbf16>
    %30 = vector.shape_cast %29 : vector<1x640x128xbf16> to vector<640x128xbf16>
    %cst_33 = arith.constant dense<0.000000e+00> : vector<24x128xf32>
    %31 = tpu.matmul %28, %30, %cst_33 {dimension_numbers = #tpu.dot_dimension_numbers<[1], [0], [0], [1], [0, 0, 1, 1], [], []>} : vector<24x640xbf16>, vector<640x128xbf16>, vector<24x128xf32> -> vector<24x128xf32>
    %c1_34 = arith.constant 1 : index
    %c0_35 = arith.constant 0 : index
    %c0_36 = arith.constant 0 : index
    %32 = vector.load %arg3[%c1_34, %c0_35, %c0_36] : memref<3x1x128xf32, #tpu.memory_space<vmem>>, vector<1x1x128xf32>
    %33 = vector.shape_cast %32 : vector<1x1x128xf32> to vector<1x128xf32>
    %34 = vector.broadcast %33 : vector<1x128xf32> to vector<24x128xf32>
    %35 = arith.addf %31, %34 : vector<24x128xf32>
    %36 = math.tanh %35 : vector<24x128xf32>
    %37 = arith.truncf %36 : vector<24x128xf32> to vector<24x128xbf16>
    %c8_37 = arith.constant 8 : index
    %c0_38 = arith.constant 0 : index
    %38 = vector.load %arg5[%c8_37, %c0_38] : memref<40x128xbf16, #tpu.memory_space<vmem>>, vector<24x128xbf16>
    tpu.vector_store %arg5[%c8_37, %c0_38], %37 {strides = array<i32>} : memref<40x128xbf16, #tpu.memory_space<vmem>>, vector<24x128xbf16>,
    %c6_39 = arith.constant 6 : index
    %c0_40 = arith.constant 0 : index
    %39 = vector.load %arg5[%c6_39, %c0_40] : memref<40x128xbf16, #tpu.memory_space<vmem>>, vector<24x128xbf16>
    %c7_41 = arith.constant 7 : index
    %c0_42 = arith.constant 0 : index
    %40 = vector.load %arg5[%c7_41, %c0_42] : memref<40x128xbf16, #tpu.memory_space<vmem>>, vector<24x128xbf16>
    %c8_43 = arith.constant 8 : index
    %c0_44 = arith.constant 0 : index
    %41 = vector.load %arg5[%c8_43, %c0_44] : memref<40x128xbf16, #tpu.memory_space<vmem>>, vector<24x128xbf16>
    %c9_45 = arith.constant 9 : index
    %c0_46 = arith.constant 0 : index
    %42 = vector.load %arg5[%c9_45, %c0_46] : memref<40x128xbf16, #tpu.memory_space<vmem>>, vector<24x128xbf16>
    %c10_47 = arith.constant 10 : index
    %c0_48 = arith.constant 0 : index
    %43 = vector.load %arg5[%c10_47, %c0_48] : memref<40x128xbf16, #tpu.memory_space<vmem>>, vector<24x128xbf16>
    %44 = tpu.concatenate %39, %40, %41, %42, %43 in 1 : vector<24x128xbf16>, vector<24x128xbf16>, vector<24x128xbf16>, vector<24x128xbf16>, vector<24x128xbf16> -> vector<24x640xbf16>
    %c2 = arith.constant 2 : index
    %c0_49 = arith.constant 0 : index
    %c0_50 = arith.constant 0 : index
    %45 = vector.load %arg2[%c2, %c0_49, %c0_50] : memref<3x640x128xbf16, #tpu.memory_space<vmem>>, vector<1x640x128xbf16>
    %46 = vector.shape_cast %45 : vector<1x640x128xbf16> to vector<640x128xbf16>
    %cst_51 = arith.constant dense<0.000000e+00> : vector<24x128xf32>
    %47 = tpu.matmul %44, %46, %cst_51 {dimension_numbers = #tpu.dot_dimension_numbers<[1], [0], [0], [1], [0, 0, 1, 1], [], []>} : vector<24x640xbf16>, vector<640x128xbf16>, vector<24x128xf32> -> vector<24x128xf32>
    %c2_52 = arith.constant 2 : index
    %c0_53 = arith.constant 0 : index
    %c0_54 = arith.constant 0 : index
    %48 = vector.load %arg3[%c2_52, %c0_53, %c0_54] : memref<3x1x128xf32, #tpu.memory_space<vmem>>, vector<1x1x128xf32>
    %49 = vector.shape_cast %48 : vector<1x1x128xf32> to vector<1x128xf32>
    %50 = vector.broadcast %49 : vector<1x128xf32> to vector<24x128xf32>
    %51 = arith.addf %47, %50 : vector<24x128xf32>
    %52 = vector.extract_strided_slice %51 {offsets = [0, 0], sizes = [24, 16], strides = [1, 1]} : vector<24x128xf32> to vector<24x16xf32>
    %c0_55 = arith.constant 0 : index
    %c0_56 = arith.constant 0 : index
    %c0_57 = arith.constant 0 : index
    %53 = vector.load %arg4[%c0_55, %c0_56, %c0_57] : memref<1x24x16xf32, #tpu.memory_space<vmem>>, vector<1x24x16xf32>
    %54 = vector.shape_cast %53 : vector<1x24x16xf32> to vector<24x16xf32>
    %55 = vector.shape_cast %52 : vector<24x16xf32> to vector<1x24x16xf32>
    tpu.vector_store %arg4[%c0_55, %c0_56, %c0_57], %55 {strides = array<i32>} : memref<1x24x16xf32, #tpu.memory_space<vmem>>, vector<1x24x16xf32>,
    return
  }
  func.func @transform_0(%arg0: i32) -> (i32, i32, i32) {
    %c0_i32 = arith.constant 0 : i32
    %c0_i32_0 = arith.constant 0 : i32
    %c0_i32_1 = arith.constant 0 : i32
    return %arg0, %c0_i32, %c0_i32_0 : i32, i32, i32
  }
  func.func @transform_1(%arg0: i32) -> (i32, i32, i32) {
    %c0_i32 = arith.constant 0 : i32
    %c0_i32_0 = arith.constant 0 : i32
    %c0_i32_1 = arith.constant 0 : i32
    %c0_i32_2 = arith.constant 0 : i32
    return %c0_i32, %c0_i32_0, %c0_i32_1 : i32, i32, i32
  }
  func.func @transform_2(%arg0: i32) -> (i32, i32, i32) {
    %c0_i32 = arith.constant 0 : i32
    %c0_i32_0 = arith.constant 0 : i32
    %c0_i32_1 = arith.constant 0 : i32
    %c0_i32_2 = arith.constant 0 : i32
    return %c0_i32, %c0_i32_0, %c0_i32_1 : i32, i32, i32
  }
  func.func @transform_3(%arg0: i32) -> (i32, i32, i32) {
    %c0_i32 = arith.constant 0 : i32
    %c0_i32_0 = arith.constant 0 : i32
    %c0_i32_1 = arith.constant 0 : i32
    return %arg0, %c0_i32, %c0_i32_0 : i32, i32, i32
  }
}

</mosaic_0001>

<bundles_post_ra>
// kernel: tpu_custom_call.1
= control target key start
LH: loop header
LB: loop body
LE: loop exit
PB: predicated region body
PF: predicated region fallthrough
CT: control target
= control target key end

     0   :  { %8 = vsyncpa [#allocation4], 0  ;;  %s2749_s12 = smov 0   ;;  %s2862_s0 = inlined_call_operand.vmem [shape: bf16[2,24,16], index: 0, kind: input, shape index: {}]   ;;  %s2863_s1 = inlined_call_operand.hbm [shape: bf16[3,640,128], index: 1, kind: input, shape index: {}]   ;;  %s2864_s2 = inlined_call_operand.vmem [shape: f32[3,1,128], index: 2, kind: input, shape index: {}]   ;;  %s2865_s3 = inlined_call_operand.vmem [shape: f32[2,24,16], index: 3, kind: output, shape index: {}]  }
   0x1 LB: > { %s2755_s13 = sadd.s32 4294967295, %s2723_s12   ;;  %p2058_p0 = scmp.ge.s32.totalorder %s2723_s12, 1  ;;  %s2723_s12 = sphi %s2749_s12, %s14_s12  }
   0x2   : > { %p113_p1 = scmp.lt.s32.totalorder %s2723_s12, 3  ;;  %s2725_s14 = smov [#allocation3]  }
   0x3   : > { %s125_s15 = sshll.u32 %s2725_s14, 4  ;;  %p2866_p3 = scmp.eq.s32.totalorder %s2755_s13, 0  ;;  %s126_s15 = int_to_ptr.vmem [resolvable:$true] %s125_s15 }
   0x4   : > { %p2759_p2 = pnand %p2058_p0, %p113_p1  ;;  %s2685_s20 = scalar_lea.hbm %s2863_s1, 15360 }
   0x5   : > { %p2686_p6 = scmp.ne.s32.totalorder %s2863_s1, %s2685_s20  ;;  %p2692_p10 = scmp.lt.u32.totalorder %s2685_s20, %s2863_s1 }
   0x6   : > { %s2868_s16 = scalar_select %p2759_p2, 1, 0 }
   0x7   : > { %p2509_p4 = pneg %p2759_p2 }
   0x9   : > { %p2768_p5 = pnand %p2866_p3, %p2509_p4 }
   0xb   : > { %p2687_p7 = pneg %p2768_p5 }
   0xd   : > { %p2688_p8 = pnand %p2687_p7, %p2686_p6 }
   0xf   : > { %p2689_p9 = pneg %p2688_p8 }
  0x11   : > { %p2694_p11 = pnand %p2692_p10, %p2689_p9 }
  0x13   : > { %2697 = shalt.err (!%p2694_p11)
}
  0x14   : > { %s2698_s25 = scalar_lea.vmem %s126_s15, 15360  ;;  %p2706_p1 = scmp.lt.s32.totalorder %s126_s15, %s126_s15 }
  0x15   : > { %p2699_p12 = scmp.ne.s32.totalorder %s126_s15, %s2698_s25  ;;  %p2707_p4 = scmp.lt.s32.totalorder %s2698_s25, %s2698_s25 }
  0x17   : > { %p2701_p13 = pnand %p2699_p12, %p2687_p7  ;;  %p2708_p3 = por %p2707_p4, %p2706_p1 }
  0x19   : > { %p2702_p0 = pneg %p2701_p13 }
  0x1b   : > { %p2709_p2 = pnand %p2708_p3, %p2702_p0 }
  0x1d   : > { %2712 = shalt.err (!%p2709_p2)
}
  0x1e   : > { %s2726_s26 = smov 64   ;;  %s2727_s27 = smov 4  }
  0x1f   : > { %2512 = dma.hbm_to_vmem [thread:$0]  (!%p2768_p5), %s2863_s1, 15360, %s126_s15, [#allocation4], %s2726_s26, %s2726_s26, %s2727_s27  }
  0x20   : > { %p2870_p6 = scmp.ne.s32.totalorder %s2868_s16, 0 }
  0x21   : > { %p2871_p8 = scmp.eq.s32.totalorder (!%p2870_p6), %s2755_s13, 0 }
  0x22   : > { %152 = sbr.rel (%p2870_p6) target bundleno = 893 (0x37d), region = 32 }
  0x29   : > { %2718 = dma.done.wait (%p2871_p8), [#allocation4], 15360   ;;  %p2872_p7 = pmov %p2871_p8 }
  0x2a   : > { %v2728_v0 = vmov 0   ;;  %v2527_v1 = vld [vmem:[#allocation3 + $0x40] sm:$0xff]   ;;  %v2531_v5 = vld [vmem:[#allocation3 + $0x48] sm:$0xff]   ;;  %v2535_v9 = vld [vmem:[#allocation3 + $0x50] sm:$0xff]   ;;  %p176_p2 = scmp.lt.s32.totalorder %s2755_s13, 1  ;;  %vm203_vm0 = vcmask 130048  }
  0x2b   : > { %2720 = vsyncadd (%p2872_p7), [#allocation4], 4294951936  ;;  %187 = vst [vmem:[#allocation2] sm:$0xf] %v2728_v0  ;;  %v2528_v2 = vld [vmem:[#allocation3] sm:$0xff]   ;;  %2245 = vmatprep.subr.bf16.mxu0 %v2527_v1  ;;  %v2532_v6 = vld [vmem:[#allocation3 + $0x8] sm:$0xff]  }
  0x2c   : > { %188 = vst [vmem:[#allocation2 + $0x4] sm:$0xf] %v2728_v0  ;;  %189 = vst [vmem:[#allocation2 + $0x8] sm:$0xf] %v2728_v0  ;;  %v2529_v3 = vld [vmem:[#allocation3 + $0xc0] sm:$0xff]   ;;  %2246 = vmatpush3.bf16.msra.mxu0 %v2528_v2  ;;  %v2533_v7 = vld [vmem:[#allocation3 + $0xc8] sm:$0xff]  }
  0x2d   : > { %190 = vst [vmem:[#allocation2 + $0xc] sm:$0xf] %v2728_v0  ;;  %191 = vst [vmem:[#allocation2 + $0x10] sm:$0xf] %v2728_v0  ;;  %v2530_v4 = vld [vmem:[#allocation3 + $0x80] sm:$0xff]   ;;  %2273 = vmatprep.subr.bf16.mxu1 %v2529_v3  ;;  %2247 = vmatprep.subr.bf16.mxu0 %v2531_v5  ;;  %v2534_v8 = vld [vmem:[#allocation3 + $0x88] sm:$0xff]  }
  0x2e   : > { %2274 = vmatpush3.bf16.msra.mxu1 %v2530_v4  ;;  %v2536_v10 = vld [vmem:[#allocation3 + $0x10] sm:$0xff]   ;;  %v2539_v13 = vld [vmem:[#allocation3 + $0x58] sm:$0xff]   ;;  %v2543_v17 = vld [vmem:[#allocation3 + $0x60] sm:$0xff]   ;;  %s2874_s13 = smov (!%p176_p2, %s2755_s13), 1  ;;  %vm246_vm1 = vsmask.f32 7424 }
  0x2f   : > { %2275 = vmatprep.subr.bf16.mxu1 %v2533_v7  ;;  %v2537_v11 = vld [vmem:[#allocation3 + $0xd0] sm:$0xff]   ;;  %v2540_v14 = vld [vmem:[#allocation3 + $0x18] sm:$0xff]   ;;  %v2544_v18 = vld [vmem:[#allocation3 + $0x20] sm:$0xff]   ;;  %s2503_s30 = smul.u32 12, %s2874_s13  ;;  %vm264_vm2 = vcmask 1042432   ;;  %vm390_vm3 = vcmask 1044480  }
  0x30   : > { %2248 = vmatpush3.bf16.msra.mxu0 %v2532_v6  ;;  %v2538_v12 = vld [vmem:[#allocation3 + $0x90] sm:$0xff]   ;;  %v2541_v15 = vld [vmem:[#allocation3 + $0xd8] sm:$0xff]   ;;  %v2545_v19 = vld [vmem:[#allocation3 + $0xe0] sm:$0xff]   ;;  %vm278_vm4 = vsmask.f32 2304  ;;  %vm299_vm5 = vcmask 1041408  }
  0x31   : > { %2249 = vmatprep.subr.bf16.mxu0 %v2535_v9  ;;  %v2542_v16 = vld [vmem:[#allocation3 + $0x98] sm:$0xff]   ;;  %v2546_v20 = vld [vmem:[#allocation3 + $0xa0] sm:$0xff]   ;;  %v2547_v21 = vld [vmem:[#allocation3 + $0x68] sm:$0xff]   ;;  %s180_s6 = scalar_lea.vmem %s2862_s0, %s2503_s30  ;;  %s2504_s15 = smul.u32 24, %s2874_s13 }
  0x32   : > { %2276 = vmatpush3.bf16.msra.mxu1 %v2534_v8  ;;  %v2548_v22 = vld [vmem:[#allocation3 + $0x28] sm:$0xff]   ;;  %v2551_v25 = vld [vmem:[#allocation3 + $0x70] sm:$0xff]   ;;  %v2555_v29 = vld [vmem:[#allocation3 + $0x78] sm:$0xff]  }
  0x33   : > { %2277 = vmatprep.subr.bf16.mxu1 %v2537_v11  ;;  %v2549_v23 = vld [vmem:[#allocation3 + $0xe8] sm:$0xff]   ;;  %v2552_v26 = vld [vmem:[#allocation3 + $0x30] sm:$0xff]   ;;  %v2556_v30 = vld [vmem:[#allocation3 + $0x38] sm:$0xff]   ;;  %s185_s18 = scalar_lea.vmem %s2865_s3, %s2504_s15 }
  0x34   : > { %2250 = vmatpush3.bf16.msra.mxu0 %v2536_v10  ;;  %v2550_v24 = vld [vmem:[#allocation3 + $0xa8] sm:$0xff]   ;;  %v2553_v27 = vld [vmem:[#allocation3 + $0xf0] sm:$0xff]   ;;  %v2557_v31 = vld [vmem:[#allocation3 + $0xf8] sm:$0xff]  }
  0x35   : > { %2251 = vmatprep.subr.bf16.mxu0 %v2539_v13  ;;  %v2554_v28 = vld [vmem:[#allocation3 + $0xb0] sm:$0xff]   ;;  %v2562_v34 = vld [vmem:[#allocation3 + $0xb8] sm:$0xff]   ;;  %v2804_v40 = vld [vmem:[#allocation3 + $0x100] sm:$0xff]  }
  0x36   : > { %2278 = vmatpush3.bf16.msra.mxu1 %v2538_v12  ;;  %v2558_v32 = vld [vmem:[%s180_s6] sm:$0xff]   ;;  %v2559_v33 = vld [vmem:[%s180_s6 + $0x8] ss:$0 sps:$4 sm:$0xff]  }
  0x37   : > { %2279 = vmatprep.subr.bf16.mxu1 %v2541_v15  ;;  %v206_v35 = vsel %vm203_vm0, %v2558_v32, 0  ;;  %v208_v36 = vsel %vm203_vm0, %v2559_v33, 0  ;;  %v223_v41 = vld [vmem:[#allocation2] sm:$0x8] }
  0x38   : > { %2252 = vmatpush3.bf16.msra.mxu0 %v2540_v14  ;;  %v2067_v37 = vcombine.low %v206_v35, %v206_v35  ;;  %v2068_v38 = vcombine.high %v206_v35, %v206_v35  ;;  %v2069_v39 = vcombine.low %v208_v36, %v208_v36  ;;  %v2571_v35 = vld [vmem:[#allocation3 + $0x118] sm:$0xff]  }
  0x39   : > { %2253 = vmatprep.subr.bf16.mxu0 %v2543_v17 }
  0x3a   : > { %2280 = vmatpush3.bf16.msra.mxu1 %v2542_v16  ;;  %220 = vst [vmem:[#allocation2 + $0x4] sm:$0xf] %v2067_v37  ;;  %221 = vst [vmem:[#allocation2 + $0x8] sm:$0xf] %v2068_v38  ;;  %v2572_v37 = vld [vmem:[#allocation3 + $0x120] sm:$0xff]   ;;  %v2573_v38 = vld [vmem:[#allocation3 + $0x128] sm:$0xff]  }
  0x3b   : > { %2281 = vmatprep.subr.bf16.mxu1 %v2545_v19  ;;  %222 = vst [vmem:[#allocation2 + $0xc] sm:$0xf] %v2069_v39  ;;  %v2574_v39 = vld [vmem:[#allocation3 + $0x130] sm:$0xff]  }
  0x3c   : > { %2254 = vmatpush3.bf16.msra.mxu0 %v2544_v18 }
  0x3d   : > { %2255 = vmatprep.subr.bf16.mxu0 %v2547_v21 }
  0x3e   : > { %2282 = vmatpush3.bf16.msra.mxu1 %v2546_v20 }
  0x3f   : > { %2283 = vmatprep.subr.bf16.mxu1 %v2549_v23 }
  0x40   : > { %2256 = vmatpush3.bf16.msra.mxu0 %v2548_v22 }
  0x41   : > { %2257 = vmatprep.subr.bf16.mxu0 %v2551_v25  ;;  %v224_v42 = vld [vmem:[#allocation2 + $0x4] sm:$0xf]  ;;  %v225_v43 = vld [vmem:[#allocation2 + $0x8] sm:$0xf] }
  0x42   : > { %2284 = vmatpush3.bf16.msra.mxu1 %v2550_v24  ;;  %v227_v44 = vld [vmem:[#allocation2 + $0xc] sm:$0xf]  ;;  %v2070_v45 = vcombine.low %v223_v41, %v224_v42  ;;  %v228_v48 = vld [vmem:[#allocation2 + $0x4] sm:$0xf]  ;;  %v229_v49 = vld [vmem:[#allocation2 + $0x8] sm:$0xf]  ;;  %v2073_v53 = vcombine.low %v224_v42, %v225_v43 }
  0x43   : > { %2285 = vmatprep.subr.bf16.mxu1 %v2553_v27  ;;  %v2072_v46 = vcombine.low %v225_v43, %v227_v44  ;;  %v226_v47 = vld [vmem:[#allocation2 + $0xc] sm:$0x7]  ;;  %v2075_v51 = vcombine.low %v228_v48, %v229_v49  ;;  %v232_v58 = vld [vmem:[#allocation2 + $0x4] sm:$0xe]  ;;  %v2074_v62 = vcombine.low %v227_v44, %v227_v44  ;;  %v2577_v41 = vld [vmem:[#allocation3 + $0x180] sm:$0xff]  }
  0x44   : > { %2258 = vmatpush3.bf16.msra.mxu0 %v2552_v26  ;;  %v2071_v50 = vcombine.low %v225_v43, %v226_v47  ;;  %v2566_v52 = vld [vmem:[#allocation2 + $0xc] sm:$0x1f]   ;;  %v248_v54 = vshrl.u32 %v2070_v45, 16  ;;  %v250_v55 = vshll.u32 %v2070_v45, 16  ;;  %v391_v59 = vrot.slane %v2070_v45, 3  ;;  %v2578_v42 = vld [vmem:[#allocation3 + $0x140] sm:$0xff]  }
  0x45   : > { %2259 = vmatprep.subr.bf16.mxu0 %v2555_v29  ;;  %v255_v56 = vshll.u32 %v2072_v46, 16  ;;  %v259_v57 = vshrl.u32 %v2072_v46, 16  ;;  %v280_v60 = vshrl.u32 %v2075_v51, 16  ;;  %v283_v61 = vshll.u32 %v2075_v51, 16  ;;  %v2579_v43 = vld [vmem:[#allocation3 + $0x200] sm:$0xff]   ;;  %v2581_v45 = vld [vmem:[#allocation3 + $0x188] sm:$0xff]  }
  0x46   : > { %2286 = vmatpush3.bf16.msra.mxu1 %v2554_v28  ;;  %v252_v63 = vrot.slane %v250_v55, 1  ;;  %v288_v1 = vshrl.u32 %v2566_v52, 16  ;;  %v291_v2 = vshll.u32 %v2566_v52, 16  ;;  %v392_v3 = vrot.slane %v2071_v50, 3  ;;  %v2569_v28 = vld [vmem:[#allocation3 + $0x108] sm:$0xff]   ;;  %v2580_v44 = vld [vmem:[#allocation3 + $0x1c0] sm:$0xff]  }
  0x47   : > { %2287 = vmatprep.subr.bf16.mxu1 %v2557_v31  ;;  %v257_v0 = vrot.slane %v255_v56, 1  ;;  %v282_v4 = vrot.slane %v280_v60, 5  ;;  %v285_v5 = vrot.slane %v283_v61, 6  ;;  %v265_v6 = vrot.slane %v2073_v53, 5  ;;  %v2582_v46 = vld [vmem:[#allocation3 + $0x148] sm:$0xff]   ;;  %v2586_v50 = vld [vmem:[#allocation3 + $0x150] sm:$0xff]  }
  0x48   : > { %2260 = vmatpush3.bf16.msra.mxu0 %v2556_v30  ;;  %v253_v7 = vor.u32 %v252_v63, %v248_v54  ;;  %v290_v9 = vrot.slane %v288_v1, 5  ;;  %v293_v10 = vrot.slane %v291_v2, 6  ;;  %v266_v12 = vrot.slane %v2074_v62, 5  ;;  %v2583_v47 = vld [vmem:[#allocation3 + $0x208] sm:$0xff]   ;;  %v2587_v51 = vld [vmem:[#allocation3 + $0x210] sm:$0xff]   ;;  %v2589_v53 = vld [vmem:[#allocation3 + $0x198] sm:$0xff]  }
  0x49   : > { %2443 = vmatprep.subr.bf16.mxu0 %v2804_v40  ;;  %v261_v8 = vor.u32 %v259_v57, %v257_v0  ;;  %v286_v11 = vor.u32 %v285_v5, %v282_v4  ;;  %v397_v13 = vrot.slane %v265_v6, 3  ;;  %v2077_v14 = vcombine.low %v232_v58, %v229_v49  ;;  %v2584_v48 = vld [vmem:[#allocation3 + $0x1c8] sm:$0xff]   ;;  %v2585_v49 = vld [vmem:[#allocation3 + $0x190] sm:$0xff]   ;;  %v2590_v54 = vld [vmem:[#allocation3 + $0x158] sm:$0xff]  }
  0x4a   : > { %2288 = vmatpush3.bf16.msra.mxu1 %v2562_v34  ;;  %v258_v15 = vsel %vm246_vm1, %v253_v7, %v257_v0  ;;  %v294_v17 = vor.u32 %v293_v10, %v290_v9  ;;  %v301_v18 = vrot.slane %v2566_v52, 6  ;;  %v267_v21 = vsel %vm264_vm2, %v265_v6, %v266_v12  ;;  %v2570_v34 = vld [vmem:[#allocation3 + $0x110] sm:$0xff]   ;;  %v2591_v55 = vld [vmem:[#allocation3 + $0x218] sm:$0xff]   ;;  %v2593_v57 = vld [vmem:[#allocation3 + $0x1a0] sm:$0xff]  }
  0x4b   : > { %v395_v16 = vrot.slane %v261_v8, 3  ;;  %v394_v19 = vrot.slane %v258_v15, 3  ;;  %v400_v20 = vrot.slane %v286_v11, 3  ;;  %v300_v22 = vrot.slane %v2077_v14, 6  ;;  %2311 = vmatprep.subr.bf16.mxu1 %v2577_v41  ;;  %v2588_v52 = vld [vmem:[#allocation3 + $0x1d0] sm:$0xff]   ;;  %v2592_v56 = vld [vmem:[#allocation3 + $0x1d8] sm:$0xff]  }
  0x4c   : > { %v393_v23 = vsel %vm390_vm3, %v391_v59, %v392_v3  ;;  %v295_v24 = vsel %vm278_vm4, %v286_v11, %v294_v17  ;;  %v398_v25 = vrot.slane %v267_v21, 3  ;;  %v2594_v58 = vld [vmem:[#allocation3 + $0x160] sm:$0xff]   ;;  %v2597_v60 = vld [vmem:[#allocation3 + $0x1a8] sm:$0xff]   ;;  %v2601_v0 = vld [vmem:[#allocation3 + $0x1b0] sm:$0xff]  }
  0x4d   : > { %v396_v26 = vsel %vm390_vm3, %v394_v19, %v395_v16  ;;  %v401_v27 = vrot.slane %v295_v24, 3  ;;  %v302_v29 = vsel %vm299_vm5, %v300_v22, %v301_v18  ;;  %v403_v31 = vrot.slane %v300_v22, 3  ;;  %v2595_v59 = vld [vmem:[#allocation3 + $0x220] sm:$0xff]   ;;  %v2599_v62 = vld [vmem:[#allocation3 + $0x228] sm:$0xff]   ;;  %v2603_v2 = vld [vmem:[#allocation3 + $0x230] sm:$0xff]  }
  0x4e   : > { %688 = vmatprep.mubr.bf16.mxu0 %v396_v26  ;;  %v399_v30 = vsel %vm390_vm3, %v397_v13, %v398_v25  ;;  %v404_v32 = vrot.slane %v302_v29, 3  ;;  %v2596_v61 = vld [vmem:[#allocation3 + $0x1e0] sm:$0xff]   ;;  %v2598_v63 = vld [vmem:[#allocation3 + $0x168] sm:$0xff]   ;;  %v2605_v4 = vld [vmem:[#allocation3 + $0x1b8] sm:$0xff]  }
  0x4f   : > { %689 = vmatmul.mubr.bf16.vlgmr.msra.gmra.mrb[0].mxu0 %v393_v23  ;;  %v402_v33 = vsel %vm390_vm3, %v400_v20, %v401_v27  ;;  %v2600_v1 = vld [vmem:[#allocation3 + $0x1e8] sm:$0xff]   ;;  %v2604_v5 = vld [vmem:[#allocation3 + $0x1f0] sm:$0xff]   ;;  %v2607_v6 = vld [vmem:[#allocation3 + $0x238] sm:$0xff]  }
  0x50   : > { %736 = vmatprep.mubr.bf16.mxu1 %v402_v33  ;;  %2444 = vmatpush3.bf16.msra.mxu0 %v2804_v40  ;;  %v405_v36 = vsel %vm390_vm3, %v403_v31, %v404_v32  ;;  %v2575_v40 = vld [vmem:[#allocation3 + $0x138] sm:$0xff]   ;;  %v2817_v9 = vld [vmem:[#allocation3 + $0x240] sm:$0xff]   ;;  %v2078_v11 = vld [vmem:[%s2864_s2] ss:$0 sm:$0xff] }
  0x51   : > { %737 = vmatmul.mubr.bf16.vlgmr.msra.gmra.mrb[0].mxu1 %v399_v30  ;;  %2445 = vmatprep.subr.bf16.mxu0 %v2569_v28  ;;  %v2606_v7 = vld [vmem:[#allocation3 + $0x178] sm:$0xff]  }
  0x52   : > { %696 = vmatprep.mubr.bf16.mxu0 %v395_v16  ;;  %744 = vmatprep.mubr.bf16.mxu1 %v401_v27  ;;  %v2608_v8 = vld [vmem:[#allocation3 + $0x1f8] sm:$0xff]  }
  0x53   : > { %2312 = vmatpush3.bf16.msra.mxu1 %v2578_v42 }
  0x54   : > { %2446 = vmatpush3.bf16.msra.mxu0 %v2569_v28  ;;  %2313 = vmatprep.subr.bf16.mxu1 %v2581_v45 }
  0x55   : > { %2447 = vmatprep.subr.bf16.mxu0 %v2570_v34 }
  0x57   : > { %697 = vmatmul.mubr.bf16.gmra.mrb[4].mxu0 %v392_v3  ;;  %2314 = vmatpush3.bf16.msra.mxu1 %v2582_v46  ;;  %v2602_v3 = vld [vmem:[#allocation3 + $0x170] sm:$0xff]  }
  0x58   : > { %2448 = vmatpush3.bf16.msra.mxu0 %v2570_v34  ;;  %2459 = vmatprep.mubr.bf16.mxu0 %v405_v36 }
  0x59   : > { %2449 = vmatprep.subr.bf16.mxu0 %v2571_v35  ;;  %745 = vmatmul.mubr.bf16.gmra.mrb[4].mxu1 %v398_v25 }
  0x5a   : > { %2315 = vmatprep.subr.bf16.mxu1 %v2585_v49 }
  0x5b   : > { %2316 = vmatpush3.bf16.msra.mxu1 %v2586_v50 }
  0x5c   : > { %2450 = vmatpush3.bf16.msra.mxu0 %v2571_v35  ;;  %2317 = vmatprep.subr.bf16.mxu1 %v2589_v53 }
  0x5d   : > { %2451 = vmatprep.subr.bf16.mxu0 %v2572_v37 }
  0x5f   : > { %2318 = vmatpush3.bf16.msra.mxu1 %v2590_v54 }
  0x60   : > { %2452 = vmatpush3.bf16.msra.mxu0 %v2572_v37  ;;  %2319 = vmatprep.subr.bf16.mxu1 %v2593_v57 }
  0x61   : > { %2453 = vmatprep.subr.bf16.mxu0 %v2573_v38 }
  0x63   : > { %2320 = vmatpush3.bf16.msra.mxu1 %v2594_v58 }
  0x64   : > { %2454 = vmatpush3.bf16.msra.mxu0 %v2573_v38  ;;  %2321 = vmatprep.subr.bf16.mxu1 %v2597_v60 }
  0x65   : > { %2455 = vmatprep.subr.bf16.mxu0 %v2574_v39 }
  0x67   : > { %2322 = vmatpush3.bf16.msra.mxu1 %v2598_v63 }
  0x68   : > { %2456 = vmatpush3.bf16.msra.mxu0 %v2574_v39  ;;  %2323 = vmatprep.subr.bf16.mxu1 %v2601_v0 }
  0x69   : > { %2457 = vmatprep.subr.bf16.mxu0 %v2575_v40 }
  0x6b   : > { %2324 = vmatpush3.bf16.msra.mxu1 %v2602_v3 }
  0x6c   : > { %2458 = vmatpush3.bf16.msra.mxu0 %v2575_v40  ;;  %2325 = vmatprep.subr.bf16.mxu1 %v2605_v4 }
  0x6d   : > { %2339 = vmatprep.subr.bf16.mxu0 %v2579_v43 }
  0x6f   : > { %2460 = vmatmul.mubr.bf16.vlgmr.msra.gmra.mrb[8].mxu0 %v404_v32  ;;  %2326 = vmatpush3.bf16.msra.mxu1 %v2606_v7 }
  0x70   : > { %2340 = vmatpush3.bf16.msra.mxu0 %v2580_v44  ;;  %2463 = vmatprep.subr.bf16.mxu1 %v2817_v9 }
  0x71   : > { %2341 = vmatprep.subr.bf16.mxu0 %v2583_v47 }
  0x74   : > { %2342 = vmatpush3.bf16.msra.mxu0 %v2584_v48 }
  0x75   : > { %2343 = vmatprep.subr.bf16.mxu0 %v2587_v51  ;;  %v819_v51 = vld [vmem:[#allocation2] sm:$0x8] }
  0x78   : > { %2344 = vmatpush3.bf16.msra.mxu0 %v2588_v52 }
  0x79   : > { %2345 = vmatprep.subr.bf16.mxu0 %v2591_v55 }
  0x7c   : > { %2346 = vmatpush3.bf16.msra.mxu0 %v2592_v56 }
  0x7d   : > { %2347 = vmatprep.subr.bf16.mxu0 %v2595_v59 }
  0x80   : > { %2348 = vmatpush3.bf16.msra.mxu0 %v2596_v61 }
  0x81   : > { %2349 = vmatprep.subr.bf16.mxu0 %v2599_v62 }
  0x84   : > { %2350 = vmatpush3.bf16.msra.mxu0 %v2600_v1 }
  0x85   : > { %2351 = vmatprep.subr.bf16.mxu0 %v2603_v2 }
  0x88   : > { %2352 = vmatpush3.bf16.msra.mxu0 %v2604_v5 }
  0x89   : > { %2353 = vmatprep.subr.bf16.mxu0 %v2607_v6 }
  0x8c   : > { %2354 = vmatpush3.bf16.msra.mxu0 %v2608_v8 }
 0x122   : > { %v2261_v10 = vpop.f32.mrb[0].mxu0 }
 0x123   : > { %v2262_v12 = vpop.f32.mrb[1].mxu0 }
 0x124   : > { %v2263_v13 = vadd.f32 %v2262_v12, %v2261_v10  ;;  %v2264_v14 = vpop.f32.mrb[2].mxu0  ;;  %v2289_v15 = vpop.f32.mrb[0].mxu1 }
 0x125   : > { %v2265_v16 = vpop.f32.mrb[3].mxu0  ;;  %v2290_v17 = vpop.f32.mrb[1].mxu1 }
 0x126   : > { %v691_v18 = vadd.f32 %v2263_v13, %v2078_v11  ;;  %v2266_v19 = vadd.f32 %v2265_v16, %v2264_v14  ;;  %v2291_v20 = vadd.f32 %v2290_v17, %v2289_v15  ;;  %v2292_v21 = vpop.f32.mrb[2].mxu1 }
 0x127   : > { %v2293_v22 = vpop.f32.mrb[3].mxu1 }
 0x128   : > { %v694_v23 = vadd.f32 %v2266_v19, %v2078_v11  ;;  %v2294_v24 = vadd.f32 %v2293_v22, %v2292_v21  ;;  %v739_v25 = vadd.f32 %v2291_v20, %v691_v18 }
 0x12a   : > { %v2267_v26 = vpop.f32.mrb[4].mxu0  ;;  %v742_v27 = vadd.f32 %v2294_v24, %v694_v23 }
 0x12b   : > { %v2268_v28 = vpop.f32.mrb[5].mxu0 }
 0x12c   : > { %v2269_v29 = vadd.f32 %v2268_v28, %v2267_v26  ;;  %v2270_v30 = vpop.f32.mrb[6].mxu0  ;;  %v2295_v31 = vpop.f32.mrb[4].mxu1 }
 0x12d   : > { %v2271_v32 = vpop.f32.mrb[7].mxu0  ;;  %v2296_v33 = vpop.f32.mrb[5].mxu1 }
 0x12e   : > { %v699_v34 = vadd.f32 %v2269_v29, %v2078_v11  ;;  %v2297_v35 = vadd.f32 %v2296_v33, %v2295_v31  ;;  %v2298_v36 = vpop.f32.mrb[6].mxu1 }
 0x12f   : > { %v2299_v37 = vpop.f32.mrb[7].mxu1 }
 0x130   : > { %v747_v38 = vadd.f32 %v2297_v35, %v699_v34 }
 0x142   : > { %v2461_v39 = vpop.f32.mrb[8].mxu0 }
 0x143   : > { %v795_v40 = vadd.f32 %v2461_v39, %v747_v38  ;;  %v786_v41 = vpop.f32.mrb[9].mxu0  ;;  %v2617_v39 = vld [vmem:[#allocation3 + $0x248] sm:$0xff]  }
 0x144   : > { %v787_v42 = vadd.f32 %v786_v41, %v739_v25  ;;  %v2462_v43 = vpop.f32.mrb[10].mxu0 }
 0x145   : > { %v789_v44 = vpop.f32.mrb[11].mxu0  ;;  %v2618_v43 = vld [vmem:[#allocation3 + $0x250] sm:$0xff]  }
 0x146   : > { %2673 = vtanh.f32 %v787_v42  ;;  %v790_v45 = vadd.f32 %v789_v44, %v742_v27 }
 0x147   : > { %2675 = vtanh.f32 %v795_v40 }
 0x148   : > { %2677 = vtanh.f32 %v790_v45 }
 0x150   : > { %v2674_v46 = vpop.eup %2673 }
 0x151   : > { %v2676_v47 = vpop.eup %2675  ;;  %v2227_v48 = vpack.c.bf16 %v2674_v46, %v2674_v46  ;;  %v2620_v46 = vld [vmem:[#allocation3 + $0x258] sm:$0xff]  }
 0x152   : > { %v2678_v49 = vpop.eup %2677 }
 0x153   : > { %816 = vst [vmem:[#allocation2 + $0x4] sm:$0xf] %v2227_v48  ;;  %v2236_v50 = vpack.c.bf16 %v2676_v47, %v2678_v49  ;;  %v2622_v48 = vld [vmem:[#allocation3 + $0x268] sm:$0xff]   ;;  %v2623_v49 = vld [vmem:[#allocation3 + $0x270] sm:$0xff]  }
 0x155   : > { %2243 = vst [vmem:[#allocation2 + $0x8] sm:$0xff] %v2236_v50   ;;  %v2624_v50 = vld [vmem:[#allocation3 + $0x278] sm:$0xff]  }
 0x15a   : > { %v820_v52 = vld [vmem:[#allocation2 + $0x4] sm:$0xf] }
 0x15b   : > { %v2122_v53 = vcombine.low %v819_v51, %v820_v52  ;;  %v824_v54 = vld [vmem:[#allocation2 + $0x4] sm:$0xf]  ;;  %v2625_v51 = vld [vmem:[#allocation3 + $0x2c0] sm:$0xff]  }
 0x15c   : > { %v821_v55 = vld [vmem:[#allocation2 + $0x8] sm:$0xf]  ;;  %v823_v56 = vld [vmem:[#allocation2 + $0xc] sm:$0xf]  ;;  %v828_v23 = vld [vmem:[#allocation2 + $0x4] sm:$0xe]  ;;  %2377 = vmatprep.subr.bf16.mxu0 %v2625_v51 }
 0x15d   : > { %v822_v57 = vld [vmem:[#allocation2 + $0xc] sm:$0x7]  ;;  %v2124_v58 = vcombine.low %v821_v55, %v823_v56  ;;  %v845_v59 = vshll.u32 %v2122_v53, 16  ;;  %v825_v60 = vld [vmem:[#allocation2 + $0x8] sm:$0xf]  ;;  %v843_v61 = vshrl.u32 %v2122_v53, 16  ;;  %v2125_v1 = vcombine.low %v820_v52, %v821_v55 }
 0x15e   : > { %v2123_v62 = vcombine.low %v821_v55, %v822_v57  ;;  %v2127_v63 = vcombine.low %v824_v54, %v825_v60  ;;  %v2614_v0 = vld [vmem:[#allocation2 + $0xc] sm:$0x1f]   ;;  %v984_v4 = vrot.slane %v2122_v53, 3  ;;  %v2126_v5 = vcombine.low %v823_v56, %v823_v56  ;;  %v2626_v52 = vld [vmem:[#allocation3 + $0x280] sm:$0xff]   ;;  %v2629_v55 = vld [vmem:[#allocation3 + $0x2c8] sm:$0xff]  }
 0x15f   : > { %v847_v2 = vrot.slane %v845_v59, 1  ;;  %v850_v3 = vshll.u32 %v2124_v58, 16  ;;  %v881_v8 = vshrl.u32 %v2614_v0, 16  ;;  %v884_v10 = vshll.u32 %v2614_v0, 16  ;;  %v2627_v53 = vld [vmem:[#allocation3 + $0x340] sm:$0xff]   ;;  %v2630_v56 = vld [vmem:[#allocation3 + $0x288] sm:$0xff]  }
 0x160   : > { %v873_v6 = vshrl.u32 %v2127_v63, 16  ;;  %v876_v7 = vshll.u32 %v2127_v63, 16  ;;  %v854_v13 = vshrl.u32 %v2124_v58, 16  ;;  %v859_v14 = vrot.slane %v2125_v1, 5  ;;  %v2628_v54 = vld [vmem:[#allocation3 + $0x300] sm:$0xff]   ;;  %v2631_v57 = vld [vmem:[#allocation3 + $0x348] sm:$0xff]  }
 0x161   : > { %v848_v11 = vor.u32 %v847_v2, %v843_v61  ;;  %v852_v12 = vrot.slane %v850_v3, 1  ;;  %v883_v17 = vrot.slane %v881_v8, 5  ;;  %v886_v18 = vrot.slane %v884_v10, 6  ;;  %v2632_v58 = vld [vmem:[#allocation3 + $0x308] sm:$0xff]   ;;  %v2633_v59 = vld [vmem:[#allocation3 + $0x2d0] sm:$0xff]   ;;  %v2637_v63 = vld [vmem:[#allocation3 + $0x2d8] sm:$0xff]  }
 0x162   : > { %v875_v15 = vrot.slane %v873_v6, 5  ;;  %v878_v16 = vrot.slane %v876_v7, 6  ;;  %v985_v21 = vrot.slane %v2123_v62, 3  ;;  %v860_v22 = vrot.slane %v2126_v5, 5  ;;  %v2635_v61 = vld [vmem:[#allocation3 + $0x350] sm:$0xff]   ;;  %v2638_v1 = vld [vmem:[#allocation3 + $0x298] sm:$0xff]  }
 0x163   : > { %v853_v19 = vsel %vm246_vm1, %v848_v11, %v852_v12  ;;  %v856_v20 = vor.u32 %v854_v13, %v852_v12  ;;  %v887_v26 = vor.u32 %v886_v18, %v883_v17  ;;  %v2129_v27 = vcombine.low %v828_v23, %v825_v60  ;;  %v2634_v60 = vld [vmem:[#allocation3 + $0x290] sm:$0xff]   ;;  %v2641_v2 = vld [vmem:[#allocation3 + $0x2e0] sm:$0xff]   ;;  %v2640_v3 = vld [vmem:[#allocation3 + $0x318] sm:$0xff]  }
 0x164   : > { %v987_v24 = vrot.slane %v853_v19, 3  ;;  %v879_v25 = vor.u32 %v878_v16, %v875_v15  ;;  %v861_v29 = vsel %vm264_vm2, %v859_v14, %v860_v22  ;;  %v990_v30 = vrot.slane %v859_v14, 3  ;;  %v2636_v62 = vld [vmem:[#allocation3 + $0x310] sm:$0xff]   ;;  %v2642_v5 = vld [vmem:[#allocation3 + $0x2a0] sm:$0xff]   ;;  %v2645_v6 = vld [vmem:[#allocation3 + $0x2e8] sm:$0xff]  }
 0x165   : > { %v988_v28 = vrot.slane %v856_v20, 3  ;;  %v893_v31 = vrot.slane %v2614_v0, 6  ;;  %v991_v34 = vrot.slane %v861_v29, 3  ;;  %v892_v35 = vrot.slane %v2129_v27, 6  ;;  %v2639_v0 = vld [vmem:[#allocation3 + $0x358] sm:$0xff]   ;;  %v2644_v7 = vld [vmem:[#allocation3 + $0x320] sm:$0xff]  }
 0x166   : > { %v888_v32 = vsel %vm278_vm4, %v879_v25, %v887_v26  ;;  %v993_v33 = vrot.slane %v879_v25, 3  ;;  %v986_v38 = vsel %vm390_vm3, %v984_v4, %v985_v21  ;;  %v2643_v4 = vld [vmem:[#allocation3 + $0x360] sm:$0xff]   ;;  %v2647_v8 = vld [vmem:[#allocation3 + $0x368] sm:$0xff]   ;;  %v2649_v11 = vld [vmem:[#allocation3 + $0x2f0] sm:$0xff]  }
 0x167   : > { %v989_v36 = vsel %vm390_vm3, %v987_v24, %v988_v28  ;;  %v994_v37 = vrot.slane %v888_v32, 3  ;;  %v992_v41 = vsel %vm390_vm3, %v990_v30, %v991_v34  ;;  %v894_v42 = vsel %vm299_vm5, %v892_v35, %v893_v31  ;;  %v2646_v10 = vld [vmem:[#allocation3 + $0x2a8] sm:$0xff]   ;;  %v2651_v13 = vld [vmem:[#allocation3 + $0x370] sm:$0xff]   ;;  %v2653_v15 = vld [vmem:[#allocation3 + $0x2f8] sm:$0xff]  }
 0x168   : > { %1281 = vmatprep.mubr.bf16.mxu1 %v989_v36  ;;  %v996_v44 = vrot.slane %v892_v35, 3  ;;  %v997_v45 = vrot.slane %v894_v42, 3  ;;  %v2648_v12 = vld [vmem:[#allocation3 + $0x328] sm:$0xff]   ;;  %v2650_v14 = vld [vmem:[#allocation3 + $0x2b0] sm:$0xff]   ;;  %v2655_v17 = vld [vmem:[#allocation3 + $0x378] sm:$0xff]  }
 0x169   : > { %1282 = vmatmul.mubr.bf16.vlgmr.msra.gmra.mrb[8].mxu1 %v986_v38  ;;  %v995_v40 = vsel %vm390_vm3, %v993_v33, %v994_v37  ;;  %v2652_v16 = vld [vmem:[#allocation3 + $0x330] sm:$0xff]   ;;  %v2654_v18 = vld [vmem:[#allocation3 + $0x2b8] sm:$0xff]   ;;  %v2833_v19 = vld [vmem:[#allocation3 + $0x380] sm:$0xff]  }
 0x16a   : > { %1329 = vmatprep.mubr.bf16.mxu0 %v995_v40  ;;  %2464 = vmatpush3.bf16.msra.mxu1 %v2817_v9  ;;  %v998_v47 = vsel %vm390_vm3, %v996_v44, %v997_v45  ;;  %v2621_v9 = vld [vmem:[#allocation3 + $0x260] sm:$0xff]   ;;  %v2656_v20 = vld [vmem:[#allocation3 + $0x338] sm:$0xff]   ;;  %v2131_v22 = vld [vmem:[%s2864_s2 + $0x1] ss:$0 sm:$0xff] }
 0x16b   : > { %1289 = vmatprep.mubr.bf16.mxu1 %v988_v28  ;;  %1330 = vmatmul.mubr.bf16.vlgmr.msra.gmra.mrb[12].mxu0 %v992_v41 }
 0x16c   : > { %1337 = vmatprep.mubr.bf16.mxu0 %v994_v37  ;;  %2465 = vmatprep.subr.bf16.mxu1 %v2617_v39 }
 0x16d   : > { %2378 = vmatpush3.bf16.msra.mxu0 %v2626_v52 }
 0x16e   : > { %2466 = vmatpush3.bf16.msra.mxu1 %v2617_v39  ;;  %2379 = vmatprep.subr.bf16.mxu0 %v2629_v55 }
 0x16f   : > { %2467 = vmatprep.subr.bf16.mxu1 %v2618_v43 }
 0x171   : > { %1290 = vmatmul.mubr.bf16.gmra.mrb[12].mxu1 %v985_v21  ;;  %2380 = vmatpush3.bf16.msra.mxu0 %v2630_v56 }
 0x172   : > { %2468 = vmatpush3.bf16.msra.mxu1 %v2618_v43  ;;  %2479 = vmatprep.mubr.bf16.mxu1 %v998_v47 }
 0x173   : > { %1338 = vmatmul.mubr.bf16.gmra.mrb[16].mxu0 %v991_v34  ;;  %2469 = vmatprep.subr.bf16.mxu1 %v2620_v46 }
 0x174   : > { %2381 = vmatprep.subr.bf16.mxu0 %v2633_v59 }
 0x175   : > { %2382 = vmatpush3.bf16.msra.mxu0 %v2634_v60 }
 0x176   : > { %2470 = vmatpush3.bf16.msra.mxu1 %v2620_v46  ;;  %2383 = vmatprep.subr.bf16.mxu0 %v2637_v63 }
 0x177   : > { %2471 = vmatprep.subr.bf16.mxu1 %v2621_v9 }
 0x179   : > { %2384 = vmatpush3.bf16.msra.mxu0 %v2638_v1 }
 0x17a   : > { %2472 = vmatpush3.bf16.msra.mxu1 %v2621_v9  ;;  %2385 = vmatprep.subr.bf16.mxu0 %v2641_v2 }
 0x17b   : > { %2473 = vmatprep.subr.bf16.mxu1 %v2622_v48 }
 0x17d   : > { %2386 = vmatpush3.bf16.msra.mxu0 %v2642_v5 }
 0x17e   : > { %2474 = vmatpush3.bf16.msra.mxu1 %v2622_v48  ;;  %2387 = vmatprep.subr.bf16.mxu0 %v2645_v6 }
 0x17f   : > { %2475 = vmatprep.subr.bf16.mxu1 %v2623_v49 }
 0x181   : > { %2388 = vmatpush3.bf16.msra.mxu0 %v2646_v10 }
 0x182   : > { %2476 = vmatpush3.bf16.msra.mxu1 %v2623_v49  ;;  %2389 = vmatprep.subr.bf16.mxu0 %v2649_v11 }
 0x183   : > { %2477 = vmatprep.subr.bf16.mxu1 %v2624_v50 }
 0x185   : > { %2390 = vmatpush3.bf16.msra.mxu0 %v2650_v14 }
 0x186   : > { %2478 = vmatpush3.bf16.msra.mxu1 %v2624_v50  ;;  %2391 = vmatprep.subr.bf16.mxu0 %v2653_v15 }
 0x187   : > { %2405 = vmatprep.subr.bf16.mxu1 %v2627_v53 }
 0x189   : > { %2480 = vmatmul.mubr.bf16.vlgmr.msra.gmra.mrb[16].mxu1 %v997_v45  ;;  %2392 = vmatpush3.bf16.msra.mxu0 %v2654_v18 }
 0x18a   : > { %2406 = vmatpush3.bf16.msra.mxu1 %v2628_v54  ;;  %2483 = vmatprep.subr.bf16.mxu0 %v2833_v19 }
 0x18b   : > { %2407 = vmatprep.subr.bf16.mxu1 %v2631_v57 }
 0x18e   : > { %2408 = vmatpush3.bf16.msra.mxu1 %v2632_v58 }
 0x18f   : > { %2409 = vmatprep.subr.bf16.mxu1 %v2635_v61  ;;  %v1412_v61 = vld [vmem:[#allocation2] sm:$0x8] }
 0x192   : > { %2410 = vmatpush3.bf16.msra.mxu1 %v2636_v62 }
 0x193   : > { %2411 = vmatprep.subr.bf16.mxu1 %v2639_v0 }
 0x196   : > { %2412 = vmatpush3.bf16.msra.mxu1 %v2640_v3 }
 0x197   : > { %2413 = vmatprep.subr.bf16.mxu1 %v2643_v4 }
 0x19a   : > { %2414 = vmatpush3.bf16.msra.mxu1 %v2644_v7 }
 0x19b   : > { %2415 = vmatprep.subr.bf16.mxu1 %v2647_v8 }
 0x19e   : > { %2416 = vmatpush3.bf16.msra.mxu1 %v2648_v12 }
 0x19f   : > { %2417 = vmatprep.subr.bf16.mxu1 %v2651_v13 }
 0x1a2   : > { %2418 = vmatpush3.bf16.msra.mxu1 %v2652_v16 }
 0x1a3   : > { %2419 = vmatprep.subr.bf16.mxu1 %v2655_v17 }
 0x1a6   : > { %2420 = vmatpush3.bf16.msra.mxu1 %v2656_v20 }
 0x23c   : > { %v2327_v21 = vpop.f32.mrb[8].mxu1 }
 0x23d   : > { %v2328_v23 = vpop.f32.mrb[9].mxu1 }
 0x23e   : > { %v2329_v24 = vadd.f32 %v2328_v23, %v2327_v21  ;;  %v2355_v25 = vpop.f32.mrb[12].mxu0  ;;  %v2330_v26 = vpop.f32.mrb[10].mxu1 }
 0x23f   : > { %v2356_v27 = vpop.f32.mrb[13].mxu0  ;;  %v2331_v28 = vpop.f32.mrb[11].mxu1 }
 0x240   : > { %v1284_v29 = vadd.f32 %v2329_v24, %v2131_v22  ;;  %v2357_v30 = vadd.f32 %v2356_v27, %v2355_v25  ;;  %v2332_v31 = vadd.f32 %v2331_v28, %v2330_v26  ;;  %v2358_v32 = vpop.f32.mrb[14].mxu0 }
 0x241   : > { %v2359_v33 = vpop.f32.mrb[15].mxu0 }
 0x242   : > { %v1287_v34 = vadd.f32 %v2332_v31, %v2131_v22  ;;  %v2360_v35 = vadd.f32 %v2359_v33, %v2358_v32  ;;  %v1332_v36 = vadd.f32 %v2357_v30, %v1284_v29 }
 0x244   : > { %v2333_v37 = vpop.f32.mrb[12].mxu1  ;;  %v1335_v38 = vadd.f32 %v2360_v35, %v1287_v34 }
 0x245   : > { %v2334_v39 = vpop.f32.mrb[13].mxu1 }
 0x246   : > { %v2335_v40 = vadd.f32 %v2334_v39, %v2333_v37  ;;  %v2361_v41 = vpop.f32.mrb[16].mxu0  ;;  %v2336_v42 = vpop.f32.mrb[14].mxu1 }
 0x247   : > { %v2362_v43 = vpop.f32.mrb[17].mxu0  ;;  %v2337_v44 = vpop.f32.mrb[15].mxu1 }
 0x248   : > { %v1292_v45 = vadd.f32 %v2335_v40, %v2131_v22  ;;  %v2363_v46 = vadd.f32 %v2362_v43, %v2361_v41  ;;  %v2364_v47 = vpop.f32.mrb[18].mxu0 }
 0x249   : > { %v2365_v9 = vpop.f32.mrb[19].mxu0  ;;  %v2665_v47 = vld [vmem:[#allocation3 + $0x388] sm:$0xff]  }
 0x24a   : > { %v1340_v48 = vadd.f32 %v2363_v46, %v1292_v45 }
 0x25c   : > { %v2481_v49 = vpop.f32.mrb[16].mxu1 }
 0x25d   : > { %v1388_v50 = vadd.f32 %v2481_v49, %v1340_v48  ;;  %v1379_v51 = vpop.f32.mrb[17].mxu1 }
 0x25e   : > { %v1380_v52 = vadd.f32 %v1379_v51, %v1332_v36  ;;  %v2482_v53 = vpop.f32.mrb[18].mxu1 }
 0x25f   : > { %v1382_v54 = vpop.f32.mrb[19].mxu1  ;;  %v2666_v53 = vld [vmem:[#allocation3 + $0x390] sm:$0xff]  }
 0x260   : > { %2679 = vtanh.f32 %v1380_v52  ;;  %v1383_v55 = vadd.f32 %v1382_v54, %v1335_v38 }
 0x261   : > { %2681 = vtanh.f32 %v1388_v50 }
 0x262   : > { %2683 = vtanh.f32 %v1383_v55 }
 0x26a   : > { %v2680_v56 = vpop.eup %2679 }
 0x26b   : > { %v2682_v57 = vpop.eup %2681  ;;  %v2230_v58 = vpack.c.bf16 %v2680_v56, %v2680_v56  ;;  %v2668_v56 = vld [vmem:[#allocation3 + $0x398] sm:$0xff]  }
 0x26c   : > { %v2684_v59 = vpop.eup %2683 }
 0x26d   : > { %1409 = vst [vmem:[#allocation2 + $0x4] sm:$0xf] %v2230_v58  ;;  %v2241_v60 = vpack.c.bf16 %v2682_v57, %v2684_v59  ;;  %v2670_v58 = vld [vmem:[#allocation3 + $0x3a8] sm:$0xff]   ;;  %v2671_v59 = vld [vmem:[#allocation3 + $0x3b0] sm:$0xff]  }
 0x26f   : > { %2244 = vst [vmem:[#allocation2 + $0x8] sm:$0xff] %v2241_v60   ;;  %v2672_v60 = vld [vmem:[#allocation3 + $0x3b8] sm:$0xff]  }
 0x274   : > { %v1413_v62 = vld [vmem:[#allocation2 + $0x4] sm:$0xf] }
 0x275   : > { %v2175_v63 = vcombine.low %v1412_v61, %v1413_v62  ;;  %v1417_v0 = vld [vmem:[#allocation2 + $0x4] sm:$0xf] }
 0x276   : > { %v1414_v1 = vld [vmem:[#allocation2 + $0x8] sm:$0xf]  ;;  %v1416_v2 = vld [vmem:[#allocation2 + $0xc] sm:$0xf]  ;;  %v1421_v36 = vld [vmem:[#allocation2 + $0x4] sm:$0xe] }
 0x277   : > { %v1415_v3 = vld [vmem:[#allocation2 + $0xc] sm:$0x7]  ;;  %v2177_v4 = vcombine.low %v1414_v1, %v1416_v2  ;;  %v1438_v5 = vshll.u32 %v2175_v63, 16  ;;  %v2179_v6 = vcombine.low %v1416_v2, %v1416_v2  ;;  %v1418_v7 = vld [vmem:[#allocation2 + $0x8] sm:$0xf]  ;;  %v1436_v8 = vshrl.u32 %v2175_v63, 16 }
 0x278   : > { %v2180_v10 = vcombine.low %v1417_v0, %v1418_v7  ;;  %v2663_v11 = vld [vmem:[#allocation2 + $0xc] sm:$0x1f]   ;;  %v2178_v12 = vcombine.low %v1413_v62, %v1414_v1  ;;  %v2176_v16 = vcombine.low %v1414_v1, %v1415_v3  ;;  %v2182_v39 = vcombine.low %v1421_v36, %v1418_v7  ;;  %v2184_v62 = vld [vmem:[%s2864_s2 + $0x2] ss:$0 sm:$0xff] }
 0x279   : > { %v1440_v13 = vrot.slane %v1438_v5, 1  ;;  %v1443_v14 = vshll.u32 %v2177_v4, 16  ;;  %v1447_v15 = vshrl.u32 %v2177_v4, 16  ;;  %v1474_v20 = vshrl.u32 %v2663_v11, 16 }
 0x27a   : > { %v1466_v17 = vshrl.u32 %v2180_v10, 16  ;;  %v1469_v18 = vshll.u32 %v2180_v10, 16  ;;  %v1453_v21 = vrot.slane %v2179_v6, 5  ;;  %v1477_v24 = vshll.u32 %v2663_v11, 16 }
 0x27b   : > { %v1441_v22 = vor.u32 %v1440_v13, %v1436_v8  ;;  %v1445_v23 = vrot.slane %v1443_v14, 1  ;;  %v1452_v25 = vrot.slane %v2178_v12, 5  ;;  %v1476_v28 = vrot.slane %v1474_v20, 5 }
 0x27c   : > { %v1468_v26 = vrot.slane %v1466_v17, 5  ;;  %v1471_v27 = vrot.slane %v1469_v18, 6  ;;  %v1479_v31 = vrot.slane %v1477_v24, 6  ;;  %v1578_v33 = vrot.slane %v2176_v16, 3 }
 0x27d   : > { %v1446_v29 = vsel %vm246_vm1, %v1441_v22, %v1445_v23  ;;  %v1449_v30 = vor.u32 %v1447_v15, %v1445_v23  ;;  %v1454_v35 = vsel %vm264_vm2, %v1452_v25, %v1453_v21  ;;  %v1577_v40 = vrot.slane %v2175_v63, 3 }
 0x27e   : > { %v1580_v32 = vrot.slane %v1446_v29, 3  ;;  %v1472_v34 = vor.u32 %v1471_v27, %v1468_v26  ;;  %v1480_v38 = vor.u32 %v1479_v31, %v1476_v28  ;;  %v1583_v42 = vrot.slane %v1452_v25, 3 }
 0x27f   : > { %v1581_v37 = vrot.slane %v1449_v30, 3  ;;  %v1486_v43 = vrot.slane %v2663_v11, 6  ;;  %v1584_v46 = vrot.slane %v1454_v35, 3  ;;  %v1485_v9 = vrot.slane %v2182_v39, 6 }
 0x280   : > { %v1586_v41 = vrot.slane %v1472_v34, 3  ;;  %v1481_v45 = vsel %vm278_vm4, %v1472_v34, %v1480_v38  ;;  %v1579_v48 = vsel %vm390_vm3, %v1577_v40, %v1578_v33 }
 0x281   : > { %v1582_v44 = vsel %vm390_vm3, %v1580_v32, %v1581_v37  ;;  %v1587_v49 = vrot.slane %v1481_v45, 3  ;;  %v1487_v51 = vsel %vm299_vm5, %v1485_v9, %v1486_v43  ;;  %v1585_v52 = vsel %vm390_vm3, %v1583_v42, %v1584_v46 }
 0x282   : > { %1874 = vmatprep.mubr.bf16.mxu0 %v1582_v44  ;;  %v1589_v54 = vrot.slane %v1485_v9, 3  ;;  %v1590_v55 = vrot.slane %v1487_v51, 3 }
 0x283   : > { %1875 = vmatmul.mubr.bf16.vlgmr.msra.gmra.mrb[20].mxu0 %v1579_v48  ;;  %v1588_v50 = vsel %vm390_vm3, %v1586_v41, %v1587_v49 }
 0x284   : > { %2484 = vmatpush3.bf16.msra.mxu0 %v2833_v19  ;;  %1882 = vmatprep.mubr.bf16.mxu0 %v1581_v37  ;;  %v1591_v57 = vsel %vm390_vm3, %v1589_v54, %v1590_v55  ;;  %v2669_v19 = vld [vmem:[#allocation3 + $0x3a0] sm:$0xff]  }
 0x285   : > { %1922 = vmatprep.mubr.bf16.mxu1 %v1588_v50  ;;  %2485 = vmatprep.subr.bf16.mxu0 %v2665_v47 }
 0x286   : > { %1923 = vmatmul.mubr.bf16.vlgmr.msra.gmra.mrb[20].mxu1 %v1585_v52 }
 0x287   : > { %1930 = vmatprep.mubr.bf16.mxu1 %v1587_v49 }
 0x288   : > { %2486 = vmatpush3.bf16.msra.mxu0 %v2665_v47 }
 0x289   : > { %2487 = vmatprep.subr.bf16.mxu0 %v2666_v53 }
 0x28b   : > { %1883 = vmatmul.mubr.bf16.gmra.mrb[24].mxu0 %v1578_v33 }
 0x28c   : > { %2488 = vmatpush3.bf16.msra.mxu0 %v2666_v53  ;;  %2499 = vmatprep.mubr.bf16.mxu0 %v1591_v57 }
 0x28d   : > { %2489 = vmatprep.subr.bf16.mxu0 %v2668_v56 }
 0x28e   : > { %1931 = vmatmul.mubr.bf16.gmra.mrb[24].mxu1 %v1584_v46 }
 0x290   : > { %2490 = vmatpush3.bf16.msra.mxu0 %v2668_v56 }
 0x291   : > { %2491 = vmatprep.subr.bf16.mxu0 %v2669_v19 }
 0x294   : > { %2492 = vmatpush3.bf16.msra.mxu0 %v2669_v19 }
 0x295   : > { %2493 = vmatprep.subr.bf16.mxu0 %v2670_v58 }
 0x298   : > { %2494 = vmatpush3.bf16.msra.mxu0 %v2670_v58 }
 0x299   : > { %2495 = vmatprep.subr.bf16.mxu0 %v2671_v59 }
 0x29c   : > { %2496 = vmatpush3.bf16.msra.mxu0 %v2671_v59 }
 0x29d   : > { %2497 = vmatprep.subr.bf16.mxu0 %v2672_v60 }
 0x2a0   : > { %2498 = vmatpush3.bf16.msra.mxu0 %v2672_v60 }
 0x2a3   : > { %2500 = vmatmul.mubr.bf16.vlgmr.msra.gmra.mrb[28].mxu0 %v1590_v55 }
 0x356   : > { %v2393_v61 = vpop.f32.mrb[20].mxu0 }
 0x357   : > { %v2394_v63 = vpop.f32.mrb[21].mxu0 }
 0x358   : > { %v2395_v0 = vadd.f32 %v2394_v63, %v2393_v61  ;;  %v2396_v1 = vpop.f32.mrb[22].mxu0 }
 0x359   : > { %v2421_v2 = vpop.f32.mrb[20].mxu1  ;;  %v2397_v3 = vpop.f32.mrb[23].mxu0 }
 0x35a   : > { %v1877_v4 = vadd.f32 %v2395_v0, %v2184_v62  ;;  %v2422_v5 = vpop.f32.mrb[21].mxu1  ;;  %v2398_v6 = vadd.f32 %v2397_v3, %v2396_v1 }
 0x35b   : > { %v2423_v7 = vadd.f32 %v2422_v5, %v2421_v2  ;;  %v2424_v8 = vpop.f32.mrb[22].mxu1 }
 0x35c   : > { %v1880_v10 = vadd.f32 %v2398_v6, %v2184_v62  ;;  %v2425_v11 = vpop.f32.mrb[23].mxu1 }
 0x35d   : > { %v2426_v12 = vadd.f32 %v2425_v11, %v2424_v8  ;;  %v1925_v13 = vadd.f32 %v2423_v7, %v1877_v4 }
 0x35e   : > { %v2399_v14 = vpop.f32.mrb[24].mxu0 }
 0x35f   : > { %v2400_v15 = vpop.f32.mrb[25].mxu0  ;;  %v1928_v16 = vadd.f32 %v2426_v12, %v1880_v10 }
 0x360   : > { %v2401_v17 = vadd.f32 %v2400_v15, %v2399_v14  ;;  %v2402_v18 = vpop.f32.mrb[26].mxu0 }
 0x361   : > { %v2427_v20 = vpop.f32.mrb[24].mxu1  ;;  %v2403_v21 = vpop.f32.mrb[27].mxu0 }
 0x362   : > { %v1885_v22 = vadd.f32 %v2401_v17, %v2184_v62  ;;  %v2428_v23 = vpop.f32.mrb[25].mxu1 }
 0x363   : > { %v2429_v24 = vadd.f32 %v2428_v23, %v2427_v20  ;;  %v2430_v25 = vpop.f32.mrb[26].mxu1 }
 0x364   : > { %v2431_v26 = vpop.f32.mrb[27].mxu1 }
 0x365   : > { %v1933_v27 = vadd.f32 %v2429_v24, %v1885_v22 }
 0x376   : > { %v2501_v28 = vpop.f32.mrb[28].mxu0 }
 0x377   : > { %v1981_v29 = vadd.f32 %v2501_v28, %v1933_v27  ;;  %v1972_v30 = vpop.f32.mrb[29].mxu0 }
 0x378   : > { %v1973_v31 = vadd.f32 %v1972_v30, %v1925_v13  ;;  %v2502_v32 = vpop.f32.mrb[30].mxu0 }
 0x379   : > { %1988 = vst.msk [vmem:[%s185_s18 + $0x10] sm:$0xff] %vm203_vm0, %v1981_v29  ;;  %v1975_v33 = vpop.f32.mrb[31].mxu0 }
 0x37a   : > { %1986 = vst.msk [vmem:[%s185_s18] sm:$0xff] %vm203_vm0, %v1973_v31  ;;  %v1976_v34 = vadd.f32 %v1975_v33, %v1928_v16 }
 0x37c   : > { %1987 = vst.msk [vmem:[%s185_s18 + $0x8] sm:$0xff] %vm203_vm0, %v1976_v34 }
 0x37d PF: > { %s14_s12 = sadd.s32 1, %s2723_s12  }
 0x37e   : > { %p11_p3 = scmp.ge.s32.totalorder %s14_s12, 4  }
 0x380   :  { %13 = sbr.rel (!%p11_p3) target bundleno = 1 (0x1), region = 71 }
 0x387   :  { %2010 = vsyncpa [#allocation4], 1 }
 0x388   :  { %2012 = vsyncpa [#allocation4 + $0x1], 1 }

</bundles_post_ra>
